<compile_context>
chip_gen: v6e
topology: v6e:2x2x1
jax: 0.10.0
libtpu: 0.0.40
codegen_flags: <defaults>
</compile_context>

<pallas_src>
import jax
import jax.numpy as jnp
from jax import lax
from jax.experimental import pallas as pl
from jax.experimental.pallas import tpu as pltpu


# --------------------------------------------------------------------------- kernel
def mlp_kernel(x_ref,
               w1_ref, b1_ref,
               w2_ref, b2_ref,
               w3_ref, b3_ref,
               w4_ref, b4_ref,
               o_ref):
    dt = w1_ref.dtype                        # matmul operand dtype (bf16 by default)
    x = x_ref[...].astype(dt)                # (TB, 55)

    # lin1 + relu, feature-major: h[o, b] = sum_f w1[o, f] * x[b, f]  -> (128, TB)
    h = lax.dot_general(w1_ref[...], x,
                        dimension_numbers=(((1,), (1,)), ((), ())),
                        preferred_element_type=jnp.float32)
    h = jnp.maximum(h + b1_ref[...], 0.0)    # (128, TB), f32

    # lin2 + relu: (64,128) @ (128,TB) -> (64, TB)
    h = jnp.dot(w2_ref[...], h.astype(dt), preferred_element_type=jnp.float32)
    h = jnp.maximum(h + b2_ref[...], 0.0)

    # dropout(p=0.5): identity in eval/inference mode.
    # TODO(synk): training-mode dropout (Bernoulli mask via pltpu.prng_*) not emitted.

    # lin3 + relu: (32,64) @ (64,TB) -> (32, TB)
    h = jnp.dot(w3_ref[...], h.astype(dt), preferred_element_type=jnp.float32)
    h = jnp.maximum(h + b3_ref[...], 0.0)

    # lin4 + sigmoid: (1,32) @ (32,TB) -> (1, TB), lane-dense output row
    z = jnp.dot(w4_ref[...], h.astype(dt), preferred_element_type=jnp.float32)
    o_ref[...] = jax.nn.sigmoid(z + b4_ref[...]).astype(o_ref.dtype)


# --------------------------------------------------------------------------- wrapper
def _round_up(n, m):
    return ((n + m - 1) // m) * m


def _num_tensorcores():
    """2 for dual-TensorCore chips (v7x), else 1.  Never raises."""
    try:
        kind = jax.devices()[0].device_kind.lower()
        if "v7" in kind or "tpu7" in kind:
            return 2
    except Exception:
        pass
    return 1


def _choose_batch_tile(B, tb, num_cores):
    """Lane-aligned batch tile + grid size.

    On 1-TC chips (v5e/v6e): one tile up to `tb` (no artificial split).
    On 2-TC chips (v7x): keep the number of tiles even so the cores stay balanced.
    """
    tb = max(128, (int(tb) // 128) * 128)
    b128 = _round_up(B, 128)
    tbe = min(tb, b128)
    grid = -(-B // tbe)
    if num_cores >= 2 and b128 >= 256 and grid % 2 == 1:
        target = grid + 1 if grid > 1 else 2
        tbe = max(128, _round_up(-(-b128 // target), 128))
        grid = -(-B // tbe)
    return tbe, grid


def prepare_params(params, matmul_dtype=jnp.bfloat16):
    """Cast matmul weights ONCE (outside the per-call wrapper); biases stay f32."""
    out = dict(params)
    for k in ("w1", "w2", "w3", "w4"):
        out[k] = params[k].astype(matmul_dtype)
    for k in ("b1", "b2", "b3", "b4"):
        out[k] = params[k].astype(jnp.float32)
    return out


def neural_net_two_forward(x, params, *, tb=2048, num_cores=None):
    """x: (B, 55).  params use PyTorch-native layout:
        w1 (128,55)  w2 (64,128)  w3 (32,64)  w4 (1,32)   (out_features, in_features)
        b1 (128,1)   b2 (64,1)    b3 (32,1)   b4 (1,1)    f32 columns
    Weight dtype (f32 or bf16 via prepare_params) selects the MXU operand dtype;
    accumulation / biases / sigmoid are always f32.  Returns (B, 1) f32.
    """
    B, F = x.shape
    assert F == 55
    if num_cores is None:
        num_cores = _num_tensorcores()
    tbe, grid = _choose_batch_tile(B, tb, num_cores)

    w1, b1 = params["w1"], params["b1"]
    w2, b2 = params["w2"], params["b2"]
    w3, b3 = params["w3"], params["b3"]
    w4, b4 = params["w4"], params["b4"]

    full = lambda a: pl.BlockSpec(a.shape, lambda i: (0, 0))

    out_row = pl.pallas_call(
        mlp_kernel,
        out_shape=jax.ShapeDtypeStruct((1, B), jnp.float32),
        grid_spec=pltpu.PrefetchScalarGridSpec(
            num_scalar_prefetch=0,
            grid=(grid,),
            in_specs=[
                pl.BlockSpec((tbe, F), lambda i: (i, 0)),   # x tile over batch rows
                full(w1), full(b1),
                full(w2), full(b2),
                full(w3), full(b3),
                full(w4), full(b4),
            ],
            # lane-dense output: each grid step writes a (1, tbe) row segment;
            # the last (partial) block's out-of-range writes are clipped.
            out_specs=pl.BlockSpec((1, tbe), lambda i: (0, i)),
        ),
        compiler_params=pltpu.CompilerParams(
            dimension_semantics=("parallel",),
            vmem_limit_bytes=32 * 1024 * 1024),
    )(x, w1, b1, w2, b2, w3, b3, w4, b4)

    return out_row.reshape(B, 1)


# --------------------------------------------------------------------- init & reference
def init_params(key):
    """Deterministic synthetic init matching nn.Linear (PyTorch (out,in) layout)."""
    def unif(k, shape, fan_in):
        bound = 1.0 / jnp.sqrt(float(fan_in))
        return jax.random.uniform(k, shape, jnp.float32, -bound, bound)

    ks = jax.random.split(key, 8)
    return {
        "w1": unif(ks[0], (128, 55), 55),   "b1": unif(ks[1], (128, 1), 55),
        "w2": unif(ks[2], (64, 128), 128),  "b2": unif(ks[3], (64, 1), 128),
        "w3": unif(ks[4], (32, 64), 64),    "b3": unif(ks[5], (32, 1), 64),
        "w4": unif(ks[6], (1, 32), 32),     "b4": unif(ks[7], (1, 1), 32),
    }


def reference_forward(x, p):
    h = jnp.maximum(x @ p["w1"].T + p["b1"].T, 0.0)
    h = jnp.maximum(h @ p["w2"].T + p["b2"].T, 0.0)
    h = jnp.maximum(h @ p["w3"].T + p["b3"].T, 0.0)
    return jax.nn.sigmoid(h @ p["w4"].T + p["b4"].T)


# ------------------------------------------------------------------------------- main
if __name__ == "__main__":
    key = jax.random.PRNGKey(0)
    kx1, kx2, kp = jax.random.split(key, 3)
    params_f32 = init_params(kp)
    params_bf16 = prepare_params(params_f32)          # cast weights to bf16 once

    # (1) tight-precision wiring check: small batch, f32 matmul operands
    B1 = 16
    x1 = jax.random.normal(kx1, (B1, 55), jnp.float32)
    out1 = jax.block_until_ready(neural_net_two_forward(x1, params_f32))
    ref1 = reference_forward(x1, params_f32)
    assert out1.shape == (B1, 1)
    assert jnp.allclose(out1, ref1, atol=1e-4, rtol=1e-4), "f32 mismatch (B=16)"

    # (2) default bf16-operand path, ragged batch (partial edge blocks, no jnp.pad)
    B2 = 300
    x2 = jax.random.normal(kx2, (B2, 55), jnp.float32)
    out2 = jax.block_until_ready(neural_net_two_forward(x2, params_bf16))
    ref2 = reference_forward(x2, params_f32)
    assert out2.shape == (B2, 1)
    assert jnp.allclose(out2, ref2, atol=5e-2, rtol=5e-2), "bf16 mismatch (B=300)"

    # (3) multi-step grid (small forced tile) — exercises the tiled / megacore path
    out3 = jax.block_until_ready(neural_net_two_forward(x2, params_bf16, tb=256))
    assert out3.shape == (B2, 1)
    assert jnp.allclose(out3, ref2, atol=5e-2, rtol=5e-2), "bf16 tiled mismatch"

    print("KERNEL_OK")
</pallas_src>

<mosaic_0001>
module attributes {stable_mosaic.version = 11 : i64} {
  func.func @mlp_kernel(%arg0: i32, %arg1: memref<128x55xf32, #tpu.memory_space<vmem>>, %arg2: memref<128x55xf32, #tpu.memory_space<vmem>>, %arg3: memref<128x1xf32, #tpu.memory_space<vmem>>, %arg4: memref<64x128xf32, #tpu.memory_space<vmem>>, %arg5: memref<64x1xf32, #tpu.memory_space<vmem>>, %arg6: memref<32x64xf32, #tpu.memory_space<vmem>>, %arg7: memref<32x1xf32, #tpu.memory_space<vmem>>, %arg8: memref<1x32xf32, #tpu.memory_space<vmem>>, %arg9: memref<1x1xf32, #tpu.memory_space<vmem>>, %arg10: memref<1x128xf32, #tpu.memory_space<vmem>>) attributes {dimension_semantics = [#tpu.dimension_semantics<parallel>], iteration_bounds = array<i64: 1>, scalar_prefetch = 0 : i64, scratch_operands = 0 : i64, tpu.core_type = #tpu.core_type<tc>, window_params = [{transform_indices = @transform_0, window_bounds = array<i64: 128, 55>}, {pipeline_mode = #tpu.pipeline_mode<synchronous>, transform_indices = @transform_1, window_bounds = array<i64: 128, 55>}, {pipeline_mode = #tpu.pipeline_mode<synchronous>, transform_indices = @transform_2, window_bounds = array<i64: 128, 1>}, {pipeline_mode = #tpu.pipeline_mode<synchronous>, transform_indices = @transform_3, window_bounds = array<i64: 64, 128>}, {pipeline_mode = #tpu.pipeline_mode<synchronous>, transform_indices = @transform_4, window_bounds = array<i64: 64, 1>}, {pipeline_mode = #tpu.pipeline_mode<synchronous>, transform_indices = @transform_5, window_bounds = array<i64: 32, 64>}, {pipeline_mode = #tpu.pipeline_mode<synchronous>, transform_indices = @transform_6, window_bounds = array<i64: 32, 1>}, {pipeline_mode = #tpu.pipeline_mode<synchronous>, transform_indices = @transform_7, window_bounds = array<i64: 1, 32>}, {pipeline_mode = #tpu.pipeline_mode<synchronous>, transform_indices = @transform_8, window_bounds = array<i64: 1, 1>}, {transform_indices = @transform_9, window_bounds = array<i64: 1, 128>}]} {
    %c0 = arith.constant 0 : index
    %c0_0 = arith.constant 0 : index
    %0 = vector.load %arg1[%c0, %c0_0] : memref<128x55xf32, #tpu.memory_space<vmem>>, vector<128x55xf32>
    %c0_1 = arith.constant 0 : index
    %c0_2 = arith.constant 0 : index
    %1 = vector.load %arg2[%c0_1, %c0_2] : memref<128x55xf32, #tpu.memory_space<vmem>>, vector<128x55xf32>
    %cst = arith.constant dense<0.000000e+00> : vector<128x128xf32>
    %2 = tpu.matmul %1, %0, %cst {dimension_numbers = #tpu.dot_dimension_numbers<[1], [1], [0], [0], [0, 0, 1, 0], [], []>} : vector<128x55xf32>, vector<128x55xf32>, vector<128x128xf32> -> vector<128x128xf32>
    %c0_3 = arith.constant 0 : index
    %c0_4 = arith.constant 0 : index
    %3 = vector.load %arg3[%c0_3, %c0_4] : memref<128x1xf32, #tpu.memory_space<vmem>>, vector<128x1xf32>
    %4 = vector.broadcast %3 : vector<128x1xf32> to vector<128x128xf32>
    %5 = arith.addf %2, %4 : vector<128x128xf32>
    %cst_5 = arith.constant 0.000000e+00 : f32
    %6 = vector.broadcast %cst_5 : f32 to vector<128x128xf32>
    %7 = arith.maximumf %5, %6 : vector<128x128xf32>
    %c0_6 = arith.constant 0 : index
    %c0_7 = arith.constant 0 : index
    %8 = vector.load %arg4[%c0_6, %c0_7] : memref<64x128xf32, #tpu.memory_space<vmem>>, vector<64x128xf32>
    %cst_8 = arith.constant dense<0.000000e+00> : vector<64x128xf32>
    %9 = tpu.matmul %8, %7, %cst_8 {dimension_numbers = #tpu.dot_dimension_numbers<[1], [0], [0], [1], [0, 0, 1, 1], [], []>} : vector<64x128xf32>, vector<128x128xf32>, vector<64x128xf32> -> vector<64x128xf32>
    %c0_9 = arith.constant 0 : index
    %c0_10 = arith.constant 0 : index
    %10 = vector.load %arg5[%c0_9, %c0_10] : memref<64x1xf32, #tpu.memory_space<vmem>>, vector<64x1xf32>
    %11 = vector.broadcast %10 : vector<64x1xf32> to vector<64x128xf32>
    %12 = arith.addf %9, %11 : vector<64x128xf32>
    %cst_11 = arith.constant 0.000000e+00 : f32
    %13 = vector.broadcast %cst_11 : f32 to vector<64x128xf32>
    %14 = arith.maximumf %12, %13 : vector<64x128xf32>
    %c0_12 = arith.constant 0 : index
    %c0_13 = arith.constant 0 : index
    %15 = vector.load %arg6[%c0_12, %c0_13] : memref<32x64xf32, #tpu.memory_space<vmem>>, vector<32x64xf32>
    %cst_14 = arith.constant dense<0.000000e+00> : vector<32x128xf32>
    %16 = tpu.matmul %15, %14, %cst_14 {dimension_numbers = #tpu.dot_dimension_numbers<[1], [0], [0], [1], [0, 0, 1, 1], [], []>} : vector<32x64xf32>, vector<64x128xf32>, vector<32x128xf32> -> vector<32x128xf32>
    %c0_15 = arith.constant 0 : index
    %c0_16 = arith.constant 0 : index
    %17 = vector.load %arg7[%c0_15, %c0_16] : memref<32x1xf32, #tpu.memory_space<vmem>>, vector<32x1xf32>
    %18 = vector.broadcast %17 : vector<32x1xf32> to vector<32x128xf32>
    %19 = arith.addf %16, %18 : vector<32x128xf32>
    %cst_17 = arith.constant 0.000000e+00 : f32
    %20 = vector.broadcast %cst_17 : f32 to vector<32x128xf32>
    %21 = arith.maximumf %19, %20 : vector<32x128xf32>
    %c0_18 = arith.constant 0 : index
    %c0_19 = arith.constant 0 : index
    %22 = vector.load %arg8[%c0_18, %c0_19] : memref<1x32xf32, #tpu.memory_space<vmem>>, vector<1x32xf32>
    %cst_20 = arith.constant dense<0.000000e+00> : vector<1x128xf32>
    %23 = tpu.matmul %22, %21, %cst_20 {dimension_numbers = #tpu.dot_dimension_numbers<[1], [0], [0], [1], [0, 0, 1, 1], [], []>} : vector<1x32xf32>, vector<32x128xf32>, vector<1x128xf32> -> vector<1x128xf32>
    %c0_21 = arith.constant 0 : index
    %c0_22 = arith.constant 0 : index
    %24 = vector.load %arg9[%c0_21, %c0_22] : memref<1x1xf32, #tpu.memory_space<vmem>>, vector<1x1xf32>
    %25 = vector.broadcast %24 : vector<1x1xf32> to vector<1x128xf32>
    %26 = arith.addf %23, %25 : vector<1x128xf32>
    %27 = arith.negf %26 : vector<1x128xf32>
    %28 = math.exp %27 : vector<1x128xf32>
    %cst_23 = arith.constant 1.000000e+00 : f32
    %29 = vector.broadcast %cst_23 : f32 to vector<1x128xf32>
    %30 = arith.addf %29, %28 : vector<1x128xf32>
    %31 = arith.divf %29, %30 : vector<1x128xf32>
    %c0_24 = arith.constant 0 : index
    %c0_25 = arith.constant 0 : index
    %32 = vector.load %arg10[%c0_24, %c0_25] : memref<1x128xf32, #tpu.memory_space<vmem>>, vector<1x128xf32>
    tpu.vector_store %arg10[%c0_24, %c0_25], %31 {strides = array<i32>} : memref<1x128xf32, #tpu.memory_space<vmem>>, vector<1x128xf32>,
    return
  }
  func.func @transform_0(%arg0: i32) -> (i32, i32) {
    %c0_i32 = arith.constant 0 : i32
    %c0_i32_0 = arith.constant 0 : i32
    return %arg0, %c0_i32 : i32, i32
  }
  func.func @transform_1(%arg0: i32) -> (i32, i32) {
    %c0_i32 = arith.constant 0 : i32
    %c0_i32_0 = arith.constant 0 : i32
    %c0_i32_1 = arith.constant 0 : i32
    return %c0_i32, %c0_i32_0 : i32, i32
  }
  func.func @transform_2(%arg0: i32) -> (i32, i32) {
    %c0_i32 = arith.constant 0 : i32
    %c0_i32_0 = arith.constant 0 : i32
    %c0_i32_1 = arith.constant 0 : i32
    return %c0_i32, %c0_i32_0 : i32, i32
  }
  func.func @transform_3(%arg0: i32) -> (i32, i32) {
    %c0_i32 = arith.constant 0 : i32
    %c0_i32_0 = arith.constant 0 : i32
    %c0_i32_1 = arith.constant 0 : i32
    return %c0_i32, %c0_i32_0 : i32, i32
  }
  func.func @transform_4(%arg0: i32) -> (i32, i32) {
    %c0_i32 = arith.constant 0 : i32
    %c0_i32_0 = arith.constant 0 : i32
    %c0_i32_1 = arith.constant 0 : i32
    return %c0_i32, %c0_i32_0 : i32, i32
  }
  func.func @transform_5(%arg0: i32) -> (i32, i32) {
    %c0_i32 = arith.constant 0 : i32
    %c0_i32_0 = arith.constant 0 : i32
    %c0_i32_1 = arith.constant 0 : i32
    return %c0_i32, %c0_i32_0 : i32, i32
  }
  func.func @transform_6(%arg0: i32) -> (i32, i32) {
    %c0_i32 = arith.constant 0 : i32
    %c0_i32_0 = arith.constant 0 : i32
    %c0_i32_1 = arith.constant 0 : i32
    return %c0_i32, %c0_i32_0 : i32, i32
  }
  func.func @transform_7(%arg0: i32) -> (i32, i32) {
    %c0_i32 = arith.constant 0 : i32
    %c0_i32_0 = arith.constant 0 : i32
    %c0_i32_1 = arith.constant 0 : i32
    return %c0_i32, %c0_i32_0 : i32, i32
  }
  func.func @transform_8(%arg0: i32) -> (i32, i32) {
    %c0_i32 = arith.constant 0 : i32
    %c0_i32_0 = arith.constant 0 : i32
    %c0_i32_1 = arith.constant 0 : i32
    return %c0_i32, %c0_i32_0 : i32, i32
  }
  func.func @transform_9(%arg0: i32) -> (i32, i32) {
    %c0_i32 = arith.constant 0 : i32
    %c0_i32_0 = arith.constant 0 : i32
    return %c0_i32, %arg0 : i32, i32
  }
}

</mosaic_0001>

<bundles_post_ra>
// kernel: tpu_custom_call.1
= control target key start
LH: loop header
LB: loop body
LE: loop exit
PB: predicated region body
PF: predicated region fallthrough
CT: control target
= control target key end

     0   :  { %s1445_s0 = inlined_call_operand.vmem [shape: f32[16,55], index: 0, kind: input, shape index: {}]   ;;  %s1446_s1 = inlined_call_operand.vmem [shape: f32[128,55], index: 1, kind: input, shape index: {}]   ;;  %s1447_s2 = inlined_call_operand.vmem [shape: f32[128,1], index: 2, kind: input, shape index: {}]   ;;  %s1448_s3 = inlined_call_operand.vmem [shape: f32[64,128], index: 3, kind: input, shape index: {}]   ;;  %s1449_s4 = inlined_call_operand.vmem [shape: f32[64,1], index: 4, kind: input, shape index: {}]   ;;  %s1450_s5 = inlined_call_operand.vmem [shape: f32[32,64], index: 5, kind: input, shape index: {}]   ;;  %s1451_s6 = inlined_call_operand.vmem [shape: f32[32,1], index: 6, kind: input, shape index: {}]   ;;  %s1452_s7 = inlined_call_operand.vmem [shape: f32[1,32], index: 7, kind: input, shape index: {}]   ;;  %s1453_s8 = inlined_call_operand.<no memory space> [shape: f32[1,1], index: 8, kind: input, shape index: {}]   ;;  %s1454_s9 = inlined_call_operand.hbm [shape: f32[1,16], index: 9, kind: output, shape index: {}]  }
   0x1   :  { %v14_v0 = vstv %s1453_s8 }
   0x2   :  { %15 = vst [vmem:[#allocation2] sm:$0x1] %v14_v0 }
   0x3   :  { %v50_v1 = vld [vmem:[%s1445_s0 + $0x78] sm:$0xff]  ;;  %vm163_vm0 = vcmask 449536   ;;  %v49_v2 = vld [vmem:[%s1445_s0 + $0x70] sm:$0xff]  ;;  %v1102_v3 = vmov 0   ;;  %v48_v4 = vld [vmem:[%s1445_s0 + $0x68] sm:$0xff] }
   0x4   :  { %937 = vmatprep.subr.msk.mxu0 %vm163_vm0, %v50_v1  ;;  %1074 = vset.pattern.permute.xlu0 %v1102_v3  ;;  %v51_v5 = vld [vmem:[%s1446_s1] sm:$0xff]  ;;  %v82_v7 = vld [vmem:[%s1447_s2 + $0x78] sm:$0xff]  ;;  %v80_v8 = vld [vmem:[%s1447_s2 + $0x68] sm:$0xff] }
   0x5   :  { %938 = vmatpush3.xpose.msk.msra.mxu0 %vm163_vm0, %v50_v1  ;;  %1075 = vset.pattern.permute.xlu1 %v1102_v3  ;;  %v47_v6 = vld [vmem:[%s1445_s0 + $0x60] sm:$0xff]  ;;  %v46_v9 = vld [vmem:[%s1445_s0 + $0x58] sm:$0xff]  ;;  %v81_v10 = vld [vmem:[%s1447_s2 + $0x70] sm:$0xff] }
   0x6   :  { %939 = vmatprep.subr.msk.mxu0 %vm163_vm0, %v49_v2  ;;  %969 = vmatprep.mubr.msk.f32.mxu0 %vm163_vm0, %v51_v5  ;;  %v79_v11 = vld [vmem:[%s1447_s2 + $0x60] sm:$0xff]  ;;  %v45_v12 = vld [vmem:[%s1445_s0 + $0x50] sm:$0xff]  ;;  %v78_v13 = vld [vmem:[%s1447_s2 + $0x58] sm:$0xff] }
   0x7   :  { %160 = vperm.xlu0 %1074, %v82_v7   ;;  %150 = vperm.xlu1 %1075, %v80_v8   ;;  %v77_v14 = vld [vmem:[%s1447_s2 + $0x50] sm:$0xff]  ;;  %v44_v15 = vld [vmem:[%s1445_s0 + $0x48] sm:$0xff] }
   0x8   :  { %v76_v16 = vld [vmem:[%s1447_s2 + $0x48] sm:$0xff] }
   0x9   :  { %940 = vmatpush3.xpose.msk.msra.mxu0 %vm163_vm0, %v49_v2 }
   0xa   :  { %941 = vmatprep.subr.msk.mxu0 %vm163_vm0, %v48_v4 }
   0xb   :  { %155 = vperm.xlu0 %1074, %v81_v10   ;;  %145 = vperm.xlu1 %1075, %v79_v11  }
   0xd   :  { %942 = vmatpush3.xpose.msk.msra.mxu0 %vm163_vm0, %v48_v4 }
   0xe   :  { %943 = vmatprep.subr.msk.mxu0 %vm163_vm0, %v47_v6 }
   0xf   :  { %140 = vperm.xlu0 %1074, %v78_v13   ;;  %135 = vperm.xlu1 %1075, %v77_v14  }
  0x11   :  { %944 = vmatpush3.xpose.msk.msra.mxu0 %vm163_vm0, %v47_v6 }
  0x12   :  { %945 = vmatprep.subr.msk.mxu0 %vm163_vm0, %v46_v9 }
  0x15   :  { %946 = vmatpush3.xpose.msk.msra.mxu0 %vm163_vm0, %v46_v9 }
  0x16   :  { %947 = vmatprep.subr.msk.mxu0 %vm163_vm0, %v45_v12 }
  0x17   :  { %16 = vsyncpa [#allocation4], 0  ;;  %v75_v17 = vld [vmem:[%s1447_s2 + $0x40] sm:$0xff]  ;;  %130 = vperm.xlu0 %1074, %v76_v16   ;;  %v74_v19 = vld [vmem:[%s1447_s2 + $0x38] sm:$0xff]  ;;  %vm618_vm1 = vcmask 523264   ;;  %vm1104_vm2 = vmmov 0  }
  0x18   :  { %v43_v18 = vld [vmem:[%s1445_s0 + $0x40] sm:$0xff]  ;;  %125 = vperm.xlu1 %1075, %v75_v17   ;;  %v73_v20 = vld [vmem:[%s1447_s2 + $0x30] sm:$0xff]  ;;  %v42_v21 = vld [vmem:[%s1445_s0 + $0x38] sm:$0xff]  ;;  %vm731_vm3 = vcmask 261120   ;;  %s1105_s10 = smov [#allocation3]  }
  0x19   :  { %948 = vmatpush3.xpose.msk.msra.mxu0 %vm163_vm0, %v45_v12  ;;  %v72_v22 = vld [vmem:[%s1447_s2 + $0x28] sm:$0xff]  ;;  %v71_v23 = vld [vmem:[%s1447_s2 + $0x20] sm:$0xff]  ;;  %v41_v24 = vld [vmem:[%s1445_s0 + $0x30] sm:$0xff]  ;;  %s818_s11 = sshll.u32 %s1105_s10, 4  ;;  %s819_s11 = int_to_ptr.vmem [resolvable:$true] %s818_s11 }
  0x1a   :  { %949 = vmatprep.subr.msk.mxu0 %vm163_vm0, %v44_v15  ;;  %v70_v25 = vld [vmem:[%s1447_s2 + $0x18] sm:$0xff]  ;;  %v69_v26 = vld [vmem:[%s1447_s2 + $0x10] sm:$0xff]  ;;  %v40_v27 = vld [vmem:[%s1445_s0 + $0x28] sm:$0xff]  ;;  %s1084_s12 = scalar_lea.vmem %s819_s11, 32  ;;  %p1085_p1 = scmp.lt.s32.totalorder %s819_s11, %s819_s11 }
  0x1b   :  { %120 = vperm.xlu0 %1074, %v74_v19   ;;  %v68_v28 = vld [vmem:[%s1447_s2 + $0x8] sm:$0xff]  ;;  %v67_v29 = vld [vmem:[%s1447_s2] sm:$0xff]  ;;  %v436_v31 = vld [vmem:[%s1449_s4 + $0x38] sm:$0xff] }
  0x1c   :  { %115 = vperm.xlu1 %1075, %v73_v20   ;;  %v39_v30 = vld [vmem:[%s1445_s0 + $0x20] sm:$0xff]  ;;  %v435_v32 = vld [vmem:[%s1449_s4 + $0x30] sm:$0xff]  ;;  %v38_v33 = vld [vmem:[%s1445_s0 + $0x18] sm:$0xff] }
  0x1d   :  { %950 = vmatpush3.xpose.msk.msra.mxu0 %vm163_vm0, %v44_v15  ;;  %v434_v34 = vld [vmem:[%s1449_s4 + $0x28] sm:$0xff]  ;;  %v433_v35 = vld [vmem:[%s1449_s4 + $0x20] sm:$0xff]  ;;  %v37_v36 = vld [vmem:[%s1445_s0 + $0x10] sm:$0xff] }
  0x1e   :  { %951 = vmatprep.subr.msk.mxu0 %vm163_vm0, %v43_v18  ;;  %v432_v37 = vld [vmem:[%s1449_s4 + $0x18] sm:$0xff]  ;;  %v431_v38 = vld [vmem:[%s1449_s4 + $0x10] sm:$0xff]  ;;  %v36_v39 = vld [vmem:[%s1445_s0 + $0x8] sm:$0xff] }
  0x1f   :  { %110 = vperm.xlu0 %1074, %v72_v22   ;;  %v430_v40 = vld [vmem:[%s1449_s4 + $0x8] sm:$0xff]  ;;  %v429_v41 = vld [vmem:[%s1449_s4] sm:$0xff]  ;;  %v597_v43 = vld [vmem:[%s1451_s6 + $0x18] sm:$0xff] }
  0x20   :  { %105 = vperm.xlu1 %1075, %v71_v23   ;;  %v35_v42 = vld [vmem:[%s1445_s0] sm:$0xff]  ;;  %v596_v44 = vld [vmem:[%s1451_s6 + $0x10] sm:$0xff]  ;;  %v595_v45 = vld [vmem:[%s1451_s6 + $0x8] sm:$0xff] }
  0x21   :  { %952 = vmatpush3.xpose.msk.msra.mxu0 %vm163_vm0, %v43_v18  ;;  %v594_v46 = vld [vmem:[%s1451_s6] sm:$0xff]  ;;  %v52_v47 = vld [vmem:[%s1446_s1 + $0x8] sm:$0xff]  ;;  %v53_v48 = vld [vmem:[%s1446_s1 + $0x10] sm:$0xff] }
  0x22   :  { %953 = vmatprep.subr.msk.mxu0 %vm163_vm0, %v42_v21  ;;  %v721_v49 = vld [vmem:[#allocation2] sm:$0x1]  ;;  %v54_v50 = vld [vmem:[%s1446_s1 + $0x18] sm:$0xff]  ;;  %v56_v52 = vld [vmem:[%s1446_s1 + $0x28] sm:$0xff] }
  0x23   :  { %100 = vperm.xlu0 %1074, %v70_v25   ;;  %v55_v51 = vld [vmem:[%s1446_s1 + $0x20] sm:$0xff]  ;;  %v57_v53 = vld [vmem:[%s1446_s1 + $0x30] sm:$0xff]  ;;  %v58_v54 = vld [vmem:[%s1446_s1 + $0x38] sm:$0xff] }
  0x24   :  { %95 = vperm.xlu1 %1075, %v69_v26   ;;  %v59_v55 = vld [vmem:[%s1446_s1 + $0x40] sm:$0xff]  ;;  %v60_v56 = vld [vmem:[%s1446_s1 + $0x48] sm:$0xff]  ;;  %v61_v57 = vld [vmem:[%s1446_s1 + $0x50] sm:$0xff] }
  0x25   :  { %954 = vmatpush3.xpose.msk.msra.mxu0 %vm163_vm0, %v42_v21  ;;  %v62_v58 = vld [vmem:[%s1446_s1 + $0x58] sm:$0xff]  ;;  %v63_v59 = vld [vmem:[%s1446_s1 + $0x60] sm:$0xff]  ;;  %v64_v60 = vld [vmem:[%s1446_s1 + $0x68] sm:$0xff] }
  0x26   :  { %955 = vmatprep.subr.msk.mxu0 %vm163_vm0, %v41_v24  ;;  %v65_v61 = vld [vmem:[%s1446_s1 + $0x70] sm:$0xff]  ;;  %v66_v62 = vld [vmem:[%s1446_s1 + $0x78] sm:$0xff]  ;;  %v421_v63 = vld [vmem:[%s1448_s3] sm:$0xff] }
  0x27   :  { %90 = vperm.xlu0 %1074, %v68_v28   ;;  %1025 = vmatprep.mubr.f32.mxu1 %v421_v63 }
  0x28   :  { %85 = vperm.xlu1 %1075, %v67_v29  }
  0x29   :  { %956 = vmatpush3.xpose.msk.msra.mxu0 %vm163_vm0, %v41_v24 }
  0x2a   :  { %957 = vmatprep.subr.msk.mxu0 %vm163_vm0, %v40_v27 }
  0x2b   :  { %474 = vperm.xlu0 %1074, %v436_v31  }
  0x2c   :  { %469 = vperm.xlu1 %1075, %v435_v32  }
  0x2d   :  { %958 = vmatpush3.xpose.msk.msra.mxu0 %vm163_vm0, %v40_v27 }
  0x2e   :  { %959 = vmatprep.subr.msk.mxu0 %vm163_vm0, %v39_v30 }
  0x2f   :  { %464 = vperm.xlu0 %1074, %v434_v34  }
  0x30   :  { %459 = vperm.xlu1 %1075, %v433_v35  }
  0x31   :  { %960 = vmatpush3.xpose.msk.msra.mxu0 %vm163_vm0, %v39_v30 }
  0x32   :  { %961 = vmatprep.subr.msk.mxu0 %vm163_vm0, %v38_v33 }
  0x33   :  { %454 = vperm.xlu0 %1074, %v432_v37  }
  0x34   :  { %449 = vperm.xlu1 %1075, %v431_v38  }
  0x35   :  { %962 = vmatpush3.xpose.msk.msra.mxu0 %vm163_vm0, %v38_v33 }
  0x36   :  { %963 = vmatprep.subr.msk.mxu0 %vm163_vm0, %v37_v36 }
  0x37   :  { %444 = vperm.xlu0 %1074, %v430_v40  }
  0x38   :  { %439 = vperm.xlu1 %1075, %v429_v41  }
  0x39   :  { %964 = vmatpush3.xpose.msk.msra.mxu0 %vm163_vm0, %v37_v36 }
  0x3a   :  { %965 = vmatprep.subr.msk.mxu0 %vm163_vm0, %v36_v39 }
  0x3b   :  { %615 = vperm.xlu0 %1074, %v597_v43  }
  0x3c   :  { %610 = vperm.xlu1 %1075, %v596_v44  }
  0x3d   :  { %966 = vmatpush3.xpose.msk.msra.mxu0 %vm163_vm0, %v36_v39 }
  0x3e   :  { %967 = vmatprep.subr.msk.mxu0 %vm163_vm0, %v35_v42 }
  0x3f   :  { %605 = vperm.xlu0 %1074, %v595_v45  }
  0x40   :  { %600 = vperm.xlu1 %1075, %v594_v46  }
  0x41   :  { %968 = vmatpush3.xpose.msk.msra.mxu0 %vm163_vm0, %v35_v42 }
  0x43   :  { %724 = vperm.xlu0 %1074, %v721_v49  }
  0x44   :  { %970 = vmatmul.mubr.msk.f32.vlgmr.msra.gmra.mxu0 %vm163_vm0, %v52_v47 }
  0x45   :  { %972 = vmatprep.mubr.msk.f32.mxu0 %vm163_vm0, %v53_v48 }
  0x48   :  { %973 = vmatmul.mubr.msk.f32.gmra.mxu0 %vm163_vm0, %v54_v50 }
  0x49   :  { %975 = vmatprep.mubr.msk.f32.mxu0 %vm163_vm0, %v55_v51 }
  0x4c   :  { %976 = vmatmul.mubr.msk.f32.gmra.mxu0 %vm163_vm0, %v56_v52 }
  0x4d   :  { %978 = vmatprep.mubr.msk.f32.mxu0 %vm163_vm0, %v57_v53 }
  0x50   :  { %979 = vmatmul.mubr.msk.f32.gmra.mxu0 %vm163_vm0, %v58_v54 }
  0x51   :  { %981 = vmatprep.mubr.msk.f32.mxu0 %vm163_vm0, %v59_v55 }
  0x54   :  { %982 = vmatmul.mubr.msk.f32.gmra.mxu0 %vm163_vm0, %v60_v56 }
  0x55   :  { %984 = vmatprep.mubr.msk.f32.mxu0 %vm163_vm0, %v61_v57 }
  0x58   :  { %985 = vmatmul.mubr.msk.f32.gmra.mxu0 %vm163_vm0, %v62_v58 }
  0x59   :  { %987 = vmatprep.mubr.msk.f32.mxu0 %vm163_vm0, %v63_v59 }
  0x5c   :  { %988 = vmatmul.mubr.msk.f32.gmra.mxu0 %vm163_vm0, %v64_v60 }
  0x5d   :  { %990 = vmatprep.mubr.msk.f32.mxu0 %vm163_vm0, %v65_v61 }
  0x60   :  { %991 = vmatmul.mubr.msk.f32.gmra.mxu0 %vm163_vm0, %v66_v62 }
  0x82   :  { %v161_v6 = vpop.permute.xlu0 %160  ;;  %v151_v7 = vpop.permute.xlu1 %150 }
  0x86   :  { %v156_v11 = vpop.permute.xlu0 %155  ;;  %v146_v12 = vpop.permute.xlu1 %145 }
  0x8a   :  { %v141_v16 = vpop.permute.xlu0 %140  ;;  %v136_v17 = vpop.permute.xlu1 %135 }
  0x92   :  { %v131_v21 = vpop.permute.xlu0 %130 }
  0x93   :  { %v126_v23 = vpop.permute.xlu1 %125 }
  0x96   :  { %v121_v32 = vpop.permute.xlu0 %120 }
  0x97   :  { %v116_v33 = vpop.permute.xlu1 %115 }
  0x9a   :  { %v111_v40 = vpop.permute.xlu0 %110 }
  0x9b   :  { %v106_v41 = vpop.permute.xlu1 %105 }
  0x9e   :  { %v101_v48 = vpop.permute.xlu0 %100 }
  0x9f   :  { %v96_v49 = vpop.permute.xlu1 %95 }
  0xa2   :  { %v91_v56 = vpop.permute.xlu0 %90 }
  0xa3   :  { %v86_v57 = vpop.permute.xlu1 %85 }
 0x104   :  { %v1390_v0 = vpop.f32.mrf.mxu0 }
 0x105   :  { %v332_v58 = vadd.f32 %v1390_v0, %v91_v56  ;;  %v423_v0 = vld [vmem:[%s1448_s3 + $0x10] sm:$0xff] }
 0x106   :  { %v1392_v1 = vpop.f32.mrf.mxu0 }
 0x107   :  { %v327_v60 = vadd.f32 %v1392_v1, %v86_v57  ;;  %v406_v62 = vmax.f32 %v332_v58, 0.0  ;;  %v424_v1 = vld [vmem:[%s1448_s3 + $0x18] sm:$0xff] }
 0x108   :  { %v1394_v2 = vpop.f32.mrf.mxu0 }
 0x109   :  { %v342_v52 = vadd.f32 %v1394_v2, %v101_v48  ;;  %v405_v63 = vmax.f32 %v327_v60, 0.0  ;;  %v422_v2 = vld [vmem:[%s1448_s3 + $0x8] sm:$0xff]  ;;  %v720_v60 = vld [vmem:[%s1452_s7] sm:$0x1]  ;;  %s1080_s7 = scalar_lea.vmem %s819_s11, 16 }
 0x10a   :  { %v1396_v3 = vpop.f32.mrf.mxu0  ;;  %p1081_p0 = scmp.ne.s32.totalorder %s819_s11, %s1080_s7  ;;  %p1086_p2 = scmp.lt.s32.totalorder %s1084_s12, %s1080_s7 }
 0x10b   :  { %v337_v54 = vadd.f32 %v1396_v3, %v96_v49  ;;  %v408_v59 = vmax.f32 %v342_v52, 0.0  ;;  %v425_v3 = vld [vmem:[%s1448_s3 + $0x20] sm:$0xff] }
 0x10c   :  { %v977_v4 = vpop.f32.mrf.mxu0  ;;  %p1087_p3 = por %p1086_p2, %p1085_p1 }
 0x10d   :  { %v352_v46 = vadd.f32 %v977_v4, %v111_v40  ;;  %v407_v61 = vmax.f32 %v337_v54, 0.0  ;;  %v426_v4 = vld [vmem:[%s1448_s3 + $0x28] sm:$0xff] }
 0x10e   :  { %v346_v5 = vpop.f32.mrf.mxu0  ;;  %v591_v40 = vld [vmem:[%s1450_s5 + $0x8] sm:$0xff]  ;;  %p1088_p4 = pnand %p1087_p3, %p1081_p0 }
 0x10f   :  { %v347_v50 = vadd.f32 %v346_v5, %v106_v41  ;;  %v410_v53 = vmax.f32 %v352_v46, 0.0  ;;  %v427_v5 = vld [vmem:[%s1448_s3 + $0x30] sm:$0xff] }
 0x110   :  { %v980_v8 = vpop.f32.mrf.mxu0  ;;  %v592_v41 = vld [vmem:[%s1450_s5 + $0x10] sm:$0xff] }
 0x111   :  { %v362_v42 = vadd.f32 %v980_v8, %v121_v32  ;;  %v409_v55 = vmax.f32 %v347_v50, 0.0 }
 0x112   :  { %v356_v9 = vpop.f32.mrf.mxu0 }
 0x113   :  { %v357_v44 = vadd.f32 %v356_v9, %v116_v33  ;;  %v412_v47 = vmax.f32 %v362_v42, 0.0  ;;  %v593_v42 = vld [vmem:[%s1450_s5 + $0x18] sm:$0xff] }
 0x114   :  { %v983_v10 = vpop.f32.mrf.mxu0 }
 0x115   :  { %v372_v36 = vadd.f32 %v983_v10, %v131_v21  ;;  %v411_v51 = vmax.f32 %v357_v44, 0.0  ;;  %v475_v10 = vpop.permute.xlu0 %474 }
 0x116   :  { %v366_v13 = vpop.f32.mrf.mxu0 }
 0x117   :  { %v367_v38 = vadd.f32 %v366_v13, %v126_v23  ;;  %v414_v43 = vmax.f32 %v372_v36, 0.0 }
 0x118   :  { %v986_v14 = vpop.f32.mrf.mxu0 }
 0x119   :  { %v382_v30 = vadd.f32 %v986_v14, %v141_v16  ;;  %v413_v45 = vmax.f32 %v367_v38, 0.0 }
 0x11a   :  { %v376_v15 = vpop.f32.mrf.mxu0 }
 0x11b   :  { %v377_v34 = vadd.f32 %v376_v15, %v136_v17  ;;  %v416_v37 = vmax.f32 %v382_v30, 0.0  ;;  %v465_v15 = vpop.permute.xlu0 %464 }
 0x11c   :  { %v989_v18 = vpop.f32.mrf.mxu0 }
 0x11d   :  { %v392_v25 = vadd.f32 %v989_v18, %v151_v7  ;;  %v415_v39 = vmax.f32 %v377_v34, 0.0  ;;  %v590_v7 = vld [vmem:[%s1450_s5] sm:$0xff] }
 0x11e   :  { %v386_v19 = vpop.f32.mrf.mxu0 }
 0x11f   :  { %v387_v28 = vadd.f32 %v386_v19, %v146_v12  ;;  %v418_v31 = vmax.f32 %v392_v25, 0.0  ;;  %v470_v12 = vpop.permute.xlu1 %469 }
 0x120   :  { %v992_v20 = vpop.f32.mrf.mxu0 }
 0x121   :  { %v402_v22 = vadd.f32 %v992_v20, %v161_v6  ;;  %v417_v35 = vmax.f32 %v387_v28, 0.0  ;;  %v428_v6 = vld [vmem:[%s1448_s3 + $0x38] sm:$0xff] }
 0x122   :  { %v396_v24 = vpop.f32.mrf.mxu0 }
 0x123   :  { %v420_v26 = vmax.f32 %v402_v22, 0.0  ;;  %v397_v27 = vadd.f32 %v396_v24, %v156_v11  ;;  %v460_v17 = vpop.permute.xlu1 %459  ;;  %v455_v24 = vpop.permute.xlu0 %454 }
 0x125   :  { %v419_v29 = vmax.f32 %v397_v27, 0.0  ;;  %993 = vmatprep.subr.mxu1 %v420_v26 }
 0x126   :  { %994 = vmatpush3.msra.mxu1 %v420_v26 }
 0x127   :  { %995 = vmatprep.subr.mxu1 %v419_v29  ;;  %v450_v27 = vpop.permute.xlu1 %449  ;;  %v445_v32 = vpop.permute.xlu0 %444 }
 0x128   :  { %996 = vmatpush3.msra.mxu1 %v419_v29 }
 0x129   :  { %997 = vmatprep.subr.mxu1 %v418_v31 }
 0x12a   :  { %998 = vmatpush3.msra.mxu1 %v418_v31 }
 0x12b   :  { %999 = vmatprep.subr.mxu1 %v417_v35  ;;  %v616_v44 = vpop.permute.xlu0 %615 }
 0x12c   :  { %1000 = vmatpush3.msra.mxu1 %v417_v35  ;;  %v440_v35 = vpop.permute.xlu1 %439 }
 0x12d   :  { %1001 = vmatprep.subr.mxu1 %v416_v37 }
 0x12e   :  { %1002 = vmatpush3.msra.mxu1 %v416_v37 }
 0x12f   :  { %1003 = vmatprep.subr.mxu1 %v415_v39  ;;  %v606_v50 = vpop.permute.xlu0 %605 }
 0x130   :  { %1004 = vmatpush3.msra.mxu1 %v415_v39  ;;  %v611_v46 = vpop.permute.xlu1 %610 }
 0x131   :  { %1005 = vmatprep.subr.mxu1 %v414_v43 }
 0x132   :  { %1006 = vmatpush3.msra.mxu1 %v414_v43  ;;  %v1103_v43 = vmov 0.0  }
 0x133   :  { %1007 = vmatprep.subr.mxu1 %v413_v45 }
 0x134   :  { %1008 = vmatpush3.msra.mxu1 %v413_v45 }
 0x135   :  { %1009 = vmatprep.subr.mxu1 %v412_v47 }
 0x136   :  { %1010 = vmatpush3.msra.mxu1 %v412_v47 }
 0x137   :  { %1011 = vmatprep.subr.mxu1 %v411_v51 }
 0x138   :  { %1012 = vmatpush3.msra.mxu1 %v411_v51 }
 0x139   :  { %1013 = vmatprep.subr.mxu1 %v410_v53 }
 0x13a   :  { %1014 = vmatpush3.msra.mxu1 %v410_v53 }
 0x13b   :  { %1015 = vmatprep.subr.mxu1 %v409_v55 }
 0x13c   :  { %1016 = vmatpush3.msra.mxu1 %v409_v55  ;;  %v601_v55 = vpop.permute.xlu1 %600 }
 0x13d   :  { %1017 = vmatprep.subr.mxu1 %v408_v59 }
 0x13e   :  { %1018 = vmatpush3.msra.mxu1 %v408_v59 }
 0x13f   :  { %1019 = vmatprep.subr.mxu1 %v407_v61 }
 0x140   :  { %1020 = vmatpush3.msra.mxu1 %v407_v61  ;;  %v727_v61 = vlaneseq }
 0x141   :  { %1021 = vmatprep.subr.mxu1 %v406_v62 }
 0x142   :  { %1022 = vmatpush3.msra.mxu1 %v406_v62  ;;  %v728_v62 = vshrl.u32 %v727_v61, 7 }
 0x143   :  { %1023 = vmatprep.subr.mxu1 %v405_v63 }
 0x144   :  { %1024 = vmatpush3.msra.mxu1 %v405_v63  ;;  %v729_v63 = vsub.s32 0, %v728_v62 }
 0x145   :  { %1026 = vmatmul.mubr.f32.vlgmr.msra.gmra.mxu1 %v422_v2  ;;  %v725_v2 = vpop.permute.xlu0 %724 }
 0x146   :  { %1028 = vmatprep.mubr.f32.mxu1 %v423_v0  ;;  %v730_v0 = vrot.slane %v725_v2, %v729_v63 }
 0x149   :  { %1029 = vmatmul.mubr.f32.gmra.mxu1 %v424_v1 }
 0x14a   :  { %1031 = vmatprep.mubr.f32.mxu1 %v425_v3 }
 0x14d   :  { %1032 = vmatmul.mubr.f32.gmra.mxu1 %v426_v4 }
 0x14e   :  { %1034 = vmatprep.mubr.f32.mxu1 %v427_v5 }
 0x151   :  { %1035 = vmatmul.mubr.f32.gmra.mxu1 %v428_v6 }
 0x152   :  { %1053 = vmatprep.mubr.msk.f32.mxu1 %vm618_vm1, %v590_v7 }
 0x205   :  { %v1027_v8 = vpop.f32.mrf.mxu1 }
 0x206   :  { %v549_v33 = vadd.f32 %v1027_v8, %v445_v32 }
 0x207   :  { %v543_v9 = vpop.f32.mrf.mxu1 }
 0x208   :  { %v544_v36 = vadd.f32 %v543_v9, %v440_v35  ;;  %v583_v38 = vmax.f32 %v549_v33, 0.0 }
 0x209   :  { %v1030_v11 = vpop.f32.mrf.mxu1 }
 0x20a   :  { %v559_v28 = vadd.f32 %v1030_v11, %v455_v24  ;;  %v582_v39 = vmax.f32 %v544_v36, 0.0 }
 0x20b   :  { %v553_v13 = vpop.f32.mrf.mxu1 }
 0x20c   :  { %v554_v30 = vadd.f32 %v553_v13, %v450_v27  ;;  %v585_v34 = vmax.f32 %v559_v28, 0.0 }
 0x20d   :  { %v1033_v14 = vpop.f32.mrf.mxu1 }
 0x20e   :  { %v569_v21 = vadd.f32 %v1033_v14, %v465_v15  ;;  %v584_v37 = vmax.f32 %v554_v30, 0.0 }
 0x20f   :  { %v563_v16 = vpop.f32.mrf.mxu1 }
 0x210   :  { %v564_v25 = vadd.f32 %v563_v16, %v460_v17  ;;  %v587_v29 = vmax.f32 %v569_v21, 0.0 }
 0x211   :  { %v1036_v18 = vpop.f32.mrf.mxu1 }
 0x212   :  { %v579_v19 = vadd.f32 %v1036_v18, %v475_v10  ;;  %v586_v31 = vmax.f32 %v564_v25, 0.0 }
 0x213   :  { %v573_v20 = vpop.f32.mrf.mxu1 }
 0x214   :  { %v589_v22 = vmax.f32 %v579_v19, 0.0  ;;  %v574_v23 = vadd.f32 %v573_v20, %v470_v12 }
 0x216   :  { %v588_v26 = vmax.f32 %v574_v23, 0.0  ;;  %1037 = vmatprep.subr.mxu1 %v589_v22 }
 0x217   :  { %1038 = vmatpush3.msra.mxu1 %v589_v22 }
 0x218   :  { %1039 = vmatprep.subr.mxu1 %v588_v26 }
 0x219   :  { %1040 = vmatpush3.msra.mxu1 %v588_v26 }
 0x21a   :  { %1041 = vmatprep.subr.mxu1 %v587_v29 }
 0x21b   :  { %1042 = vmatpush3.msra.mxu1 %v587_v29 }
 0x21c   :  { %1043 = vmatprep.subr.mxu1 %v586_v31 }
 0x21d   :  { %1044 = vmatpush3.msra.mxu1 %v586_v31 }
 0x21e   :  { %1045 = vmatprep.subr.mxu1 %v585_v34 }
 0x21f   :  { %1046 = vmatpush3.msra.mxu1 %v585_v34 }
 0x220   :  { %1047 = vmatprep.subr.mxu1 %v584_v37 }
 0x221   :  { %1048 = vmatpush3.msra.mxu1 %v584_v37 }
 0x222   :  { %1049 = vmatprep.subr.mxu1 %v583_v38 }
 0x223   :  { %1050 = vmatpush3.msra.mxu1 %v583_v38 }
 0x224   :  { %1051 = vmatprep.subr.mxu1 %v582_v39 }
 0x225   :  { %1052 = vmatpush3.msra.mxu1 %v582_v39 }
 0x226   :  { %1054 = vmatmul.mubr.msk.f32.vlgmr.msra.gmra.mxu1 %vm618_vm1, %v591_v40  ;;  %1059 = vmatprep.subr.mxu1 %v1103_v43 }
 0x227   :  { %1056 = vmatprep.mubr.msk.f32.mxu1 %vm618_vm1, %v592_v41 }
 0x22a   :  { %1057 = vmatmul.mubr.msk.f32.gmra.mxu1 %vm618_vm1, %v593_v42 }
 0x22b   :  { %1067 = vmatprep.mubr.msk.f32.mxu1 %vm1104_vm2, %v1103_v43 }
 0x2e6   :  { %v1055_v45 = vpop.f32.mrf.mxu1 }
 0x2e7   :  { %v703_v52 = vadd.f32 %v1055_v45, %v606_v50 }
 0x2e8   :  { %v697_v47 = vpop.f32.mrf.mxu1 }
 0x2e9   :  { %v698_v56 = vadd.f32 %v697_v47, %v601_v55  ;;  %v717_v58 = vmax.f32 %v703_v52, 0.0 }
 0x2ea   :  { %v1058_v48 = vpop.f32.mrf.mxu1 }
 0x2eb   :  { %v713_v49 = vadd.f32 %v1058_v48, %v616_v44  ;;  %v716_v59 = vmax.f32 %v698_v56, 0.0 }
 0x2ec   :  { %v707_v51 = vpop.f32.mrf.mxu1 }
 0x2ed   :  { %v719_v53 = vmax.f32 %v713_v49, 0.0  ;;  %v708_v54 = vadd.f32 %v707_v51, %v611_v46 }
 0x2ef   :  { %v718_v57 = vmax.f32 %v708_v54, 0.0  ;;  %1060 = vmatpush3.msra.mxu1 %v719_v53 }
 0x2f0   :  { %1061 = vmatprep.subr.mxu1 %v1103_v43 }
 0x2f1   :  { %1062 = vmatpush3.msra.mxu1 %v718_v57 }
 0x2f2   :  { %1063 = vmatprep.subr.mxu1 %v1103_v43 }
 0x2f3   :  { %1064 = vmatpush3.msra.mxu1 %v717_v58 }
 0x2f4   :  { %1065 = vmatprep.subr.mxu1 %v1103_v43 }
 0x2f5   :  { %1066 = vmatpush3.msra.mxu1 %v716_v59 }
 0x2f6   :  { %1068 = vmatmul.mubr.msk.f32.vlgmr.msra.gmra.mxu1 %vm731_vm3, %v720_v60 }
 0x3b6   :  { %v801_v1 = vpop.f32.mrf.mxu1 }
 0x3b7   :  { %v802_v3 = vadd.f32 %v801_v1, %v730_v0 }
 0x3b8   :  { %v1069_v4 = vpop.f32.mrf.mxu1 }
 0x3b9   :  { %v863_v5 = vmul.f32 -1.442695, %v802_v3 }
 0x3bb   :  { %1076 = vpow2.f32 %v863_v5 }
 0x3c8   :  { %v1077_v6 = vpop.eup %1076 }
 0x3c9   :  { %v808_v7 = vadd.f32 1.0, %v1077_v6 }
 0x3cb   :  { %1078 = vrcp.f32 %v808_v7 }
 0x3d8   :  { %v1079_v8 = vpop.eup %1078 }
 0x3d9   :  { %811 = vst [vmem:[#allocation3] sm:$0x1] %v1079_v8 }
 0x3da   :  { %1091 = shalt.err (!%p1088_p4)
}
 0x3db   :  { %821 = dma.vmem_to_hbm [thread:$0]  %s819_s11, 16, %s1454_s9, [#allocation4]  }
 0x3dc   :  { %1100 = dma.done.wait [#allocation4], 16  }
 0x3dd   :  { %1101 = vsyncadd [#allocation4], 4294967280 }
 0x3de   :  { %825 = vsyncpa [#allocation4], 1 }

</bundles_post_ra>
